<compile_context>
chip_gen: v7x
topology: tpu7x:2x2x1
jax: 0.10.0
libtpu: 0.0.40
codegen_flags: <defaults>
</compile_context>

<pallas_src>
import functools

import jax
import jax.numpy as jnp
from jax.experimental import pallas as pl
from jax.experimental.pallas import tpu as pltpu


def _fused_kernel(pos_ref, invfreq_ref, w1_ref, b1_ref, w2_ref, b2_ref,
                  w3_ref, b3_ref, o_ref):
    """Recompute emb -> h1 -> h2 (tiny), then one column tile of the last Linear."""
    pos = pos_ref[...]                        # [Bp, 1]    f32 (= motion_bucket_id * 10)
    inv_freq = invfreq_ref[...]               # [1, half]  f32
    sinusoid = pos * inv_freq                 # outer product via broadcast -> [Bp, half]
    emb = jnp.concatenate([jnp.cos(sinusoid), jnp.sin(sinusoid)], axis=-1)  # [Bp, freq_dim]

    h1 = jnp.dot(emb.astype(w1_ref.dtype), w1_ref[...],
                 preferred_element_type=jnp.float32) + b1_ref[...]
    h1 = h1 * jax.nn.sigmoid(h1)              # SiLU in f32 (EUP)
    h2 = jnp.dot(h1.astype(w2_ref.dtype), w2_ref[...],
                 preferred_element_type=jnp.float32) + b2_ref[...]
    h2 = h2 * jax.nn.sigmoid(h2)

    # out[:, j*TN:(j+1)*TN] = h2 @ w3_tile + b3_tile   (w3 tile is the streamed input)
    o_ref[...] = (jnp.dot(h2.astype(w3_ref.dtype), w3_ref[...],
                          preferred_element_type=jnp.float32)
                  + b3_ref[...]).astype(o_ref.dtype)


def _pick_col_tile(total, cap=2304):
    """Largest lane-dense (multiple-of-128) tile dividing `total`, <= cap; prefer an even
    grid length so v7x's two TensorCores split the w3 stream evenly."""
    if total % 128 != 0:
        # Non-lane-aligned out_dim: fall back to a single (masked) block. Correct but slow.
        return total
    if total <= cap:
        return total
    best_even, best_any = None, 128
    t = 128
    while t <= cap:
        if total % t == 0:
            best_any = t
            if (total // t) % 2 == 0:
                best_even = t
        t += 128
    return best_even if best_even is not None else best_any


@functools.partial(jax.jit, static_argnums=(2,))
def wan_motion_controller_forward(motion_bucket_id, params, freq_dim):
    """motion_bucket_id: [B] float. Returns [B, dim*6] float32."""
    B = motion_bucket_id.shape[0]
    half = freq_dim // 2
    dim = params["w2"].shape[0]
    out_dim = params["w3"].shape[1]

    # Pad batch to one sublane tile (8 rows); padded rows are sliced off below.
    Bp = ((B + 7) // 8) * 8
    pos = jnp.zeros((Bp, 1), jnp.float32)
    pos = pos.at[:B, 0].set(motion_bucket_id.astype(jnp.float32) * 10.0)
    inv_freq = jnp.power(
        10000.0, -jnp.arange(half, dtype=jnp.float32) / half).reshape(1, half)

    tn = _pick_col_tile(out_dim)
    n_steps = out_dim // tn

    # Advisory cost: memory-bound (bytes dominated by w3); compute is negligible.
    bytes_accessed = (
        params["w1"].size * 2 + params["w2"].size * 2 + params["w3"].size * 2   # bf16
        + (params["b1"].size + params["b2"].size + params["b3"].size) * 4       # f32
        + (Bp * 1 + half) * 4                                                    # pos, inv_freq
        + Bp * out_dim * 4)                                                      # output
    flops = (2 * Bp * dim * out_dim
             + n_steps * 2 * Bp * (freq_dim * dim + dim * dim))
    transcendentals = n_steps * Bp * (freq_dim + 2 * dim)

    out = pl.pallas_call(
        _fused_kernel,
        out_shape=jax.ShapeDtypeStruct((Bp, out_dim), jnp.float32),
        grid=(n_steps,),
        in_specs=[
            pl.BlockSpec((Bp, 1), lambda j: (0, 0)),        # pos        (resident)
            pl.BlockSpec((1, half), lambda j: (0, 0)),      # inv_freq   (resident)
            pl.BlockSpec((freq_dim, dim), lambda j: (0, 0)),  # w1       (resident)
            pl.BlockSpec((1, dim), lambda j: (0, 0)),       # b1         (resident)
            pl.BlockSpec((dim, dim), lambda j: (0, 0)),     # w2         (resident)
            pl.BlockSpec((1, dim), lambda j: (0, 0)),       # b2         (resident)
            pl.BlockSpec((dim, tn), lambda j: (0, j)),      # w3: streamed column tiles
            pl.BlockSpec((1, tn), lambda j: (0, j)),        # b3: streamed with w3
        ],
        out_specs=pl.BlockSpec((Bp, tn), lambda j: (0, j)),
        compiler_params=pltpu.CompilerParams(
            dimension_semantics=("parallel",),              # shard w3 stream on v7x 2 TCs
            vmem_limit_bytes=32 * 1024 * 1024),             # v5e default (16 MiB) too small
        cost_estimate=pl.CostEstimate(
            flops=int(flops),
            transcendentals=int(transcendentals),
            bytes_accessed=int(bytes_accessed)),
    )(pos, inv_freq, params["w1"], params["b1"], params["w2"], params["b2"],
      params["w3"], params["b3"])

    return out[:B]


def init_params(key, freq_dim, dim):
    """Deterministic synthetic parameters. Weights stored [in, out] in bf16, biases f32."""
    k1, k2, k3, k4, k5, k6 = jax.random.split(key, 6)
    s = 0.02
    return {
        "w1": (s * jax.random.normal(k1, (freq_dim, dim), jnp.float32)).astype(jnp.bfloat16),
        "b1": s * jax.random.normal(k2, (1, dim), jnp.float32),
        "w2": (s * jax.random.normal(k3, (dim, dim), jnp.float32)).astype(jnp.bfloat16),
        "b2": s * jax.random.normal(k4, (1, dim), jnp.float32),
        "w3": (s * jax.random.normal(k5, (dim, dim * 6), jnp.float32)).astype(jnp.bfloat16),
        "b3": s * jax.random.normal(k6, (1, dim * 6), jnp.float32),
    }


def reference_forward(motion_bucket_id, params, freq_dim):
    """Pure-JAX reference mirroring the PyTorch module (same bf16 cast points as the kernel)."""
    half = freq_dim // 2
    pos = motion_bucket_id.astype(jnp.float32) * 10.0
    inv_freq = jnp.power(10000.0, -jnp.arange(half, dtype=jnp.float32) / half)
    sinusoid = jnp.outer(pos, inv_freq)
    emb = jnp.concatenate([jnp.cos(sinusoid), jnp.sin(sinusoid)], axis=1)

    h1 = jnp.dot(emb.astype(jnp.bfloat16), params["w1"],
                 preferred_element_type=jnp.float32) + params["b1"]
    h1 = h1 * jax.nn.sigmoid(h1)
    h2 = jnp.dot(h1.astype(jnp.bfloat16), params["w2"],
                 preferred_element_type=jnp.float32) + params["b2"]
    h2 = (h2 * jax.nn.sigmoid(h2)).astype(jnp.bfloat16)
    return jnp.dot(h2, params["w3"], preferred_element_type=jnp.float32) + params["b3"]


if __name__ == "__main__":
    # Small shapes consistent with the module (real defaults: freq_dim=256, dim=1536).
    FREQ_DIM = 256
    DIM = 128
    BATCH = 2

    key = jax.random.PRNGKey(0)
    k_params, k_ids = jax.random.split(key)
    params = init_params(k_params, FREQ_DIM, DIM)

    # motion_bucket_id: per-sample scalar motion strength, e.g. in [0, 100)
    motion_bucket_id = jax.random.uniform(
        k_ids, (BATCH,), jnp.float32, minval=0.0, maxval=100.0)

    out = wan_motion_controller_forward(motion_bucket_id, params, FREQ_DIM)
    out = jax.block_until_ready(out)

    ref = reference_forward(motion_bucket_id, params, FREQ_DIM)
    assert out.shape == (BATCH, DIM * 6)
    assert jnp.allclose(out, ref, atol=2e-4, rtol=2e-2), "mismatch vs JAX reference"

    print("KERNEL_OK")
</pallas_src>

<mosaic_0001>
module attributes {stable_mosaic.version = 11 : i64} {
  func.func @_fused_kernel(%arg0: i32, %arg1: memref<8x1xf32, #tpu.memory_space<vmem>>, %arg2: memref<1x128xf32, #tpu.memory_space<vmem>>, %arg3: memref<256x128xbf16, #tpu.memory_space<vmem>>, %arg4: memref<1x128xf32, #tpu.memory_space<vmem>>, %arg5: memref<128x128xbf16, #tpu.memory_space<vmem>>, %arg6: memref<1x128xf32, #tpu.memory_space<vmem>>, %arg7: memref<128x768xbf16, #tpu.memory_space<vmem>>, %arg8: memref<1x768xf32, #tpu.memory_space<vmem>>, %arg9: memref<8x768xf32, #tpu.memory_space<vmem>>) attributes {dimension_semantics = [#tpu.dimension_semantics<parallel>], iteration_bounds = array<i64: 1>, scalar_prefetch = 0 : i64, scratch_operands = 0 : i64, tpu.core_type = #tpu.core_type<tc>, window_params = [{pipeline_mode = #tpu.pipeline_mode<synchronous>, transform_indices = @transform_0, window_bounds = array<i64: 8, 1>}, {pipeline_mode = #tpu.pipeline_mode<synchronous>, transform_indices = @transform_1, window_bounds = array<i64: 1, 128>}, {pipeline_mode = #tpu.pipeline_mode<synchronous>, transform_indices = @transform_2, window_bounds = array<i64: 256, 128>}, {pipeline_mode = #tpu.pipeline_mode<synchronous>, transform_indices = @transform_3, window_bounds = array<i64: 1, 128>}, {pipeline_mode = #tpu.pipeline_mode<synchronous>, transform_indices = @transform_4, window_bounds = array<i64: 128, 128>}, {pipeline_mode = #tpu.pipeline_mode<synchronous>, transform_indices = @transform_5, window_bounds = array<i64: 1, 128>}, {transform_indices = @transform_6, window_bounds = array<i64: 128, 768>}, {transform_indices = @transform_7, window_bounds = array<i64: 1, 768>}, {transform_indices = @transform_8, window_bounds = array<i64: 8, 768>}]} {
    %c0 = arith.constant 0 : index
    %c0_0 = arith.constant 0 : index
    %0 = vector.load %arg1[%c0, %c0_0] : memref<8x1xf32, #tpu.memory_space<vmem>>, vector<8x1xf32>
    %c0_1 = arith.constant 0 : index
    %c0_2 = arith.constant 0 : index
    %1 = vector.load %arg2[%c0_1, %c0_2] : memref<1x128xf32, #tpu.memory_space<vmem>>, vector<1x128xf32>
    %2 = vector.broadcast %0 : vector<8x1xf32> to vector<8x128xf32>
    %3 = vector.broadcast %1 : vector<1x128xf32> to vector<8x128xf32>
    %4 = arith.mulf %2, %3 : vector<8x128xf32>
    %5 = math.cos %4 : vector<8x128xf32>
    %6 = math.sin %4 : vector<8x128xf32>
    %7 = tpu.concatenate %5, %6 in 1 : vector<8x128xf32>, vector<8x128xf32> -> vector<8x256xf32>
    %8 = arith.truncf %7 : vector<8x256xf32> to vector<8x256xbf16>
    %c0_3 = arith.constant 0 : index
    %c0_4 = arith.constant 0 : index
    %9 = vector.load %arg3[%c0_3, %c0_4] : memref<256x128xbf16, #tpu.memory_space<vmem>>, vector<256x128xbf16>
    %cst = arith.constant dense<0.000000e+00> : vector<8x128xf32>
    %10 = tpu.matmul %8, %9, %cst {dimension_numbers = #tpu.dot_dimension_numbers<[1], [0], [0], [1], [0, 0, 1, 1], [], []>} : vector<8x256xbf16>, vector<256x128xbf16>, vector<8x128xf32> -> vector<8x128xf32>
    %c0_5 = arith.constant 0 : index
    %c0_6 = arith.constant 0 : index
    %11 = vector.load %arg4[%c0_5, %c0_6] : memref<1x128xf32, #tpu.memory_space<vmem>>, vector<1x128xf32>
    %12 = vector.broadcast %11 : vector<1x128xf32> to vector<8x128xf32>
    %13 = arith.addf %10, %12 : vector<8x128xf32>
    %14 = arith.negf %13 : vector<8x128xf32>
    %15 = math.exp %14 : vector<8x128xf32>
    %cst_7 = arith.constant 1.000000e+00 : f32
    %16 = vector.broadcast %cst_7 : f32 to vector<8x128xf32>
    %17 = arith.addf %16, %15 : vector<8x128xf32>
    %18 = arith.divf %16, %17 : vector<8x128xf32>
    %19 = arith.mulf %13, %18 : vector<8x128xf32>
    %20 = arith.truncf %19 : vector<8x128xf32> to vector<8x128xbf16>
    %c0_8 = arith.constant 0 : index
    %c0_9 = arith.constant 0 : index
    %21 = vector.load %arg5[%c0_8, %c0_9] : memref<128x128xbf16, #tpu.memory_space<vmem>>, vector<128x128xbf16>
    %cst_10 = arith.constant dense<0.000000e+00> : vector<8x128xf32>
    %22 = tpu.matmul %20, %21, %cst_10 {dimension_numbers = #tpu.dot_dimension_numbers<[1], [0], [0], [1], [0, 0, 1, 1], [], []>} : vector<8x128xbf16>, vector<128x128xbf16>, vector<8x128xf32> -> vector<8x128xf32>
    %c0_11 = arith.constant 0 : index
    %c0_12 = arith.constant 0 : index
    %23 = vector.load %arg6[%c0_11, %c0_12] : memref<1x128xf32, #tpu.memory_space<vmem>>, vector<1x128xf32>
    %24 = vector.broadcast %23 : vector<1x128xf32> to vector<8x128xf32>
    %25 = arith.addf %22, %24 : vector<8x128xf32>
    %26 = arith.negf %25 : vector<8x128xf32>
    %27 = math.exp %26 : vector<8x128xf32>
    %cst_13 = arith.constant 1.000000e+00 : f32
    %28 = vector.broadcast %cst_13 : f32 to vector<8x128xf32>
    %29 = arith.addf %28, %27 : vector<8x128xf32>
    %30 = arith.divf %28, %29 : vector<8x128xf32>
    %31 = arith.mulf %25, %30 : vector<8x128xf32>
    %32 = arith.truncf %31 : vector<8x128xf32> to vector<8x128xbf16>
    %c0_14 = arith.constant 0 : index
    %c0_15 = arith.constant 0 : index
    %33 = vector.load %arg7[%c0_14, %c0_15] : memref<128x768xbf16, #tpu.memory_space<vmem>>, vector<128x768xbf16>
    %cst_16 = arith.constant dense<0.000000e+00> : vector<8x768xf32>
    %34 = tpu.matmul %32, %33, %cst_16 {dimension_numbers = #tpu.dot_dimension_numbers<[1], [0], [0], [1], [0, 0, 1, 1], [], []>} : vector<8x128xbf16>, vector<128x768xbf16>, vector<8x768xf32> -> vector<8x768xf32>
    %c0_17 = arith.constant 0 : index
    %c0_18 = arith.constant 0 : index
    %35 = vector.load %arg8[%c0_17, %c0_18] : memref<1x768xf32, #tpu.memory_space<vmem>>, vector<1x768xf32>
    %36 = vector.broadcast %35 : vector<1x768xf32> to vector<8x768xf32>
    %37 = arith.addf %34, %36 : vector<8x768xf32>
    %c0_19 = arith.constant 0 : index
    %c0_20 = arith.constant 0 : index
    %38 = vector.load %arg9[%c0_19, %c0_20] : memref<8x768xf32, #tpu.memory_space<vmem>>, vector<8x768xf32>
    tpu.vector_store %arg9[%c0_19, %c0_20], %37 {strides = array<i32>} : memref<8x768xf32, #tpu.memory_space<vmem>>, vector<8x768xf32>,
    return
  }
  func.func @transform_0(%arg0: i32) -> (i32, i32) {
    %c0_i32 = arith.constant 0 : i32
    %c0_i32_0 = arith.constant 0 : i32
    %c0_i32_1 = arith.constant 0 : i32
    return %c0_i32, %c0_i32_0 : i32, i32
  }
  func.func @transform_1(%arg0: i32) -> (i32, i32) {
    %c0_i32 = arith.constant 0 : i32
    %c0_i32_0 = arith.constant 0 : i32
    %c0_i32_1 = arith.constant 0 : i32
    return %c0_i32, %c0_i32_0 : i32, i32
  }
  func.func @transform_2(%arg0: i32) -> (i32, i32) {
    %c0_i32 = arith.constant 0 : i32
    %c0_i32_0 = arith.constant 0 : i32
    %c0_i32_1 = arith.constant 0 : i32
    return %c0_i32, %c0_i32_0 : i32, i32
  }
  func.func @transform_3(%arg0: i32) -> (i32, i32) {
    %c0_i32 = arith.constant 0 : i32
    %c0_i32_0 = arith.constant 0 : i32
    %c0_i32_1 = arith.constant 0 : i32
    return %c0_i32, %c0_i32_0 : i32, i32
  }
  func.func @transform_4(%arg0: i32) -> (i32, i32) {
    %c0_i32 = arith.constant 0 : i32
    %c0_i32_0 = arith.constant 0 : i32
    %c0_i32_1 = arith.constant 0 : i32
    return %c0_i32, %c0_i32_0 : i32, i32
  }
  func.func @transform_5(%arg0: i32) -> (i32, i32) {
    %c0_i32 = arith.constant 0 : i32
    %c0_i32_0 = arith.constant 0 : i32
    %c0_i32_1 = arith.constant 0 : i32
    return %c0_i32, %c0_i32_0 : i32, i32
  }
  func.func @transform_6(%arg0: i32) -> (i32, i32) {
    %c0_i32 = arith.constant 0 : i32
    %c0_i32_0 = arith.constant 0 : i32
    return %c0_i32, %arg0 : i32, i32
  }
  func.func @transform_7(%arg0: i32) -> (i32, i32) {
    %c0_i32 = arith.constant 0 : i32
    %c0_i32_0 = arith.constant 0 : i32
    return %c0_i32, %arg0 : i32, i32
  }
  func.func @transform_8(%arg0: i32) -> (i32, i32) {
    %c0_i32 = arith.constant 0 : i32
    %c0_i32_0 = arith.constant 0 : i32
    return %c0_i32, %arg0 : i32, i32
  }
}

</mosaic_0001>

<bundles_post_ra>
// kernel: wan_motion_controller_forward.1
= control target key start
LH: loop header
LB: loop body
LE: loop exit
PB: predicated region body
PF: predicated region fallthrough
CT: control target
= control target key end

     0   :  { %13 = vsyncpa [#allocation3], 0  ;;  %s1548_s0 = inlined_call_operand.vmem [shape: f32[8,1], index: 0, kind: input, shape index: {}]   ;;  %s1549_s1 = inlined_call_operand.vmem [shape: f32[1,128], index: 1, kind: input, shape index: {}]   ;;  %s1550_s2 = inlined_call_operand.hbm [shape: bf16[256,128], index: 2, kind: input, shape index: {}]   ;;  %s1551_s3 = inlined_call_operand.vmem [shape: f32[1,128], index: 3, kind: input, shape index: {}]   ;;  %s1552_s4 = inlined_call_operand.hbm [shape: bf16[128,128], index: 4, kind: input, shape index: {}]   ;;  %s1553_s5 = inlined_call_operand.vmem [shape: f32[1,128], index: 5, kind: input, shape index: {}]   ;;  %s1554_s6 = inlined_call_operand.hbm [shape: bf16[128,768], index: 6, kind: input, shape index: {}]   ;;  %s1555_s7 = inlined_call_operand.vmem [shape: f32[1,768], index: 7, kind: input, shape index: {}]   ;;  %s1556_s8 = inlined_call_operand.vmem [shape: f32[8,768], index: 8, kind: output, shape index: {}]  }
   0x1   :  { %14 = vsyncpa [#allocation5], 0  ;;  %s1386_s27 = smov [#allocation4]   ;;  %s1387_s29 = smov [#allocation2]  }
   0x2   :  { %s38_s28 = sshll.u32 %s1386_s27, 4  ;;  %s24_s30 = sshll.u32 %s1387_s29, 4  ;;  %s39_s28 = int_to_ptr.vmem [resolvable:$true] %s38_s28  ;;  %s1447_s30 = int_to_ptr.vmem [resolvable:$true] %s24_s30 }
   0x3   :  { %s1316_s11 = scalar_lea.hbm %s1552_s4, 1024 }
   0x4   :  { %p1317_p0 = scmp.ne.s32.totalorder %s1552_s4, %s1316_s11  ;;  %p1320_p1 = scmp.lt.u32.totalorder %s1316_s11, %s1552_s4 }
   0x6   :  { %p1322_p2 = pnand %p1320_p1, %p1317_p0 }
   0x8   :  { %1325 = shalt.err (!%p1322_p2)
}
   0x9   :  { %s1326_s16 = scalar_lea.vmem %s39_s28, 1024  ;;  %p1331_p4 = scmp.lt.s32.totalorder %s39_s28, %s39_s28 }
   0xa   :  { %p1327_p3 = scmp.ne.s32.totalorder %s39_s28, %s1326_s16  ;;  %p1332_p5 = scmp.lt.s32.totalorder %s1326_s16, %s1326_s16 }
   0xc   :  { %p1333_p6 = por %p1332_p5, %p1331_p4 }
   0xe   :  { %p1334_p7 = pnand %p1333_p6, %p1327_p3 }
  0x10   :  { %1337 = shalt.err (!%p1334_p7)
}
  0x11   :  { %s1388_s17 = smov 64   ;;  %s1389_s18 = smov 4  }
  0x12   :  { %44 = dma.hbm_to_vmem [thread:$0]  %s1552_s4, 1024, %s39_s28, [#allocation5], %s1388_s17, %s1388_s17, %s1389_s18  }
  0x13   :  { %s1338_s23 = scalar_lea.hbm %s1550_s2, 2048 }
  0x14   :  { %p1339_p8 = scmp.ne.s32.totalorder %s1550_s2, %s1338_s23  ;;  %p1342_p9 = scmp.lt.u32.totalorder %s1338_s23, %s1550_s2 }
  0x16   :  { %p1344_p10 = pnand %p1342_p9, %p1339_p8 }
  0x18   :  { %1347 = shalt.err (!%p1344_p10)
}
  0x19   :  { %s1348_s29 = scalar_lea.vmem %s1447_s30, 2048  ;;  %p1353_p12 = scmp.lt.s32.totalorder %s1447_s30, %s1447_s30 }
  0x1a   :  { %p1349_p11 = scmp.ne.s32.totalorder %s1447_s30, %s1348_s29  ;;  %p1354_p13 = scmp.lt.s32.totalorder %s1348_s29, %s1348_s29 }
  0x1c   :  { %p1355_p0 = por %p1354_p13, %p1353_p12 }
  0x1e   :  { %p1356_p1 = pnand %p1355_p0, %p1349_p11 }
  0x20   :  { %1359 = shalt.err (!%p1356_p1)
}
  0x21   :  { %30 = dma.hbm_to_vmem [thread:$0]  %s1550_s2, 2048, %s1447_s30, [#allocation3], %s1388_s17, %s1388_s17, %s1389_s18  }
  0x22   :  { %s1390_s9 = smov [#allocation6]   ;;  %s1360_s13 = scalar_lea.hbm %s1554_s6, 6144 }
  0x23   :  { %s52_s10 = sshll.u32 %s1390_s9, 4  ;;  %p1361_p2 = scmp.ne.s32.totalorder %s1554_s6, %s1360_s13  ;;  %s53_s10 = int_to_ptr.vmem [resolvable:$true] %s52_s10 }
  0x24   :  { %p1364_p3 = scmp.lt.u32.totalorder %s1360_s13, %s1554_s6 }
  0x26   :  { %p1366_p4 = pnand %p1364_p3, %p1361_p2 }
  0x28   :  { %1369 = shalt.err (!%p1366_p4)
}
  0x29   :  { %s1370_s20 = scalar_lea.vmem %s53_s10, 6144  ;;  %p1375_p6 = scmp.lt.s32.totalorder %s53_s10, %s53_s10 }
  0x2a   :  { %p1371_p5 = scmp.ne.s32.totalorder %s53_s10, %s1370_s20  ;;  %p1376_p7 = scmp.lt.s32.totalorder %s1370_s20, %s1370_s20 }
  0x2c   :  { %p1377_p8 = por %p1376_p7, %p1375_p6 }
  0x2e   :  { %p1378_p9 = pnand %p1377_p8, %p1371_p5 }
  0x30   :  { %1381 = shalt.err (!%p1378_p9)
}
  0x31   :  { %s1391_s2 = smov 384   ;;  %s1392_s30 = smov 24  }
  0x32   :  { %58 = dma.hbm_to_vmem [thread:$0]  %s1554_s6, 6144, %s53_s10, [#allocation5], %s1391_s2, %s1391_s2, %s1392_s30  }
  0x33   :  { %1382 = dma.done.wait [#allocation3], 2048  }
  0x34   :  { %1383 = vsyncadd [#allocation3], 4294965248 }
  0x35   :  { %1384 = dma.done.wait [#allocation5], 7168  }
  0x36   :  { %1385 = vsyncadd [#allocation5], 4294960128  ;;  %v1393_v0 = vmov 0   ;;  %v71_v1 = vld [vmem:[%s1548_s0] sm:$0xff]  ;;  %v1210_v4 = vld [vmem:[#allocation2 + $0x48] sm:$0xff]  }
  0x37   :  { %1207 = vset.pattern.permute.xlu0 %v1393_v0  ;;  %v1208_v2 = vld [vmem:[#allocation2 + $0x40] sm:$0xff]   ;;  %v1211_v5 = vld [vmem:[#allocation2 + $0x8] sm:$0xff]   ;;  %v1212_v6 = vld [vmem:[#allocation2 + $0x50] sm:$0xff]   ;;  %v1394_v32 = vmov 2102212464  }
  0x38   :  { %75 = vperm.xlu0 %1207, %v71_v1   ;;  %v1209_v3 = vld [vmem:[#allocation2] sm:$0xff]   ;;  %1136 = vmatprep.subr.bf16.mxu0 %v1208_v2  ;;  %v1213_v7 = vld [vmem:[#allocation2 + $0x10] sm:$0xff]   ;;  %v1214_v8 = vld [vmem:[#allocation2 + $0x58] sm:$0xff]   ;;  %v1395_v34 = vmov 920167782  }
  0x39   :  { %1137 = vmatpush3.bf16.msra.mxu0 %v1209_v3  ;;  %v1215_v9 = vld [vmem:[#allocation2 + $0x18] sm:$0xff]   ;;  %v1216_v10 = vld [vmem:[#allocation2 + $0x60] sm:$0xff]   ;;  %v1218_v12 = vld [vmem:[#allocation2 + $0x68] sm:$0xff]   ;;  %v1396_v38 = vmov 1326507024  }
  0x3a   :  { %1138 = vmatprep.subr.bf16.mxu0 %v1210_v4  ;;  %v1217_v11 = vld [vmem:[#allocation2 + $0x20] sm:$0xff]   ;;  %v1219_v13 = vld [vmem:[#allocation2 + $0x28] sm:$0xff]   ;;  %v1220_v14 = vld [vmem:[#allocation2 + $0x70] sm:$0xff]   ;;  %v1397_v40 = vmov 683565275  }
  0x3b   :  { %v1221_v15 = vld [vmem:[#allocation2 + $0x30] sm:$0xff]   ;;  %v1222_v16 = vld [vmem:[#allocation2 + $0x78] sm:$0xff]   ;;  %v1051_v18 = vld [vmem:[%s1549_s1] ss:$0 sm:$0xff]  ;;  %v1398_v42 = vmov 2475754826  }
  0x3c   :  { %v1223_v17 = vld [vmem:[#allocation2 + $0x38] sm:$0xff]   ;;  %v1399_v45 = vmov 2131351028  }
  0x3d   :  { %1139 = vmatpush3.bf16.msra.mxu0 %v1211_v5 }
  0x3e   :  { %1140 = vmatprep.subr.bf16.mxu0 %v1212_v6 }
  0x41   :  { %1141 = vmatpush3.bf16.msra.mxu0 %v1213_v7 }
  0x42   :  { %1142 = vmatprep.subr.bf16.mxu0 %v1214_v8 }
  0x45   :  { %1143 = vmatpush3.bf16.msra.mxu0 %v1215_v9 }
  0x46   :  { %1144 = vmatprep.subr.bf16.mxu0 %v1216_v10 }
  0x49   :  { %1145 = vmatpush3.bf16.msra.mxu0 %v1217_v11 }
  0x4a   :  { %1146 = vmatprep.subr.bf16.mxu0 %v1218_v12 }
  0x4d   :  { %1147 = vmatpush3.bf16.msra.mxu0 %v1219_v13 }
  0x4e   :  { %1148 = vmatprep.subr.bf16.mxu0 %v1220_v14 }
  0x51   :  { %1149 = vmatpush3.bf16.msra.mxu0 %v1221_v15 }
  0x52   :  { %1150 = vmatprep.subr.bf16.mxu0 %v1222_v16 }
  0x55   :  { %1151 = vmatpush3.bf16.msra.mxu0 %v1223_v17 }
  0xb7   :  { %v76_v19 = vpop.permute.xlu0 %75 }
  0xb8   :  { %v1497_v20 = vmul.f32 %v1051_v18, %v76_v19 }
  0xba   :  { %v88_v21 = vand.u32 2139095040, %v1497_v20  ;;  %v85_v22 = vand.u32 2147483647, %v1497_v20  ;;  %vm87_vm7 = vcmp.lt.s32.totalorder %v1497_v20, 0  ;;  %vm177_vm15 = vweird.f32 %v1497_v20 }
  0xbc   :  { %v89_v23 = vshrl.u32 %v88_v21, 23  ;;  %v92_v25 = vand.u32 8388607, %v85_v22  ;;  %vm86_vm8 = vcmp.le.f32.partialorder %v85_v22, 0.7853982 }
  0xbe   :  { %v1052_v24 = vadd.s32 4294967169, %v89_v23  ;;  %v93_v28 = vor.u32 8388608, %v92_v25 }
  0xc0   :  { %v95_v26 = vadd.s32 1, %v1052_v24  ;;  %v133_v36 = vshll.u32 %v93_v28, 8 }
  0xc2   :  { %vm96_vm0 = vcmp.gt.s32.totalorder %v95_v26, 0 }
  0xc3   :  { %v97_v27 = vsel %vm96_vm0, %v95_v26, 0  ;;  %vm1401_vm0 = vmmov 0  }
  0xc4   :  { %v99_v29 = vand.u32 31, %v97_v27  ;;  %v98_v30 = vshrl.u32 %v97_v27, 5 }
  0xc6   :  { %v100_v31 = vsub.s32 32, %v99_v29  ;;  %v111_v33 = vshll.u32 %v1394_v32, %v99_v29  ;;  %v114_v35 = vshll.u32 %v1395_v34, %v99_v29  ;;  %v102_v41 = vshll.u32 %v1397_v40, %v99_v29 }
  0xc7   :  { %v105_v44 = vshll.u32 %v1398_v42, %v99_v29  ;;  %v108_v47 = vshll.u32 %v1399_v45, %v99_v29  ;;  %vm120_vm1 = vcmp.lt.s32.totalorder %v98_v30, 4  ;;  %vm117_vm2 = vcmp.lt.s32.totalorder %v98_v30, 1 }
  0xc8   :  { %v112_v37 = vshrl.u32 %v1395_v34, %v100_v31  ;;  %v115_v39 = vshrl.u32 %v1396_v38, %v100_v31  ;;  %v103_v43 = vshrl.u32 %v1398_v42, %v100_v31  ;;  %v106_v46 = vshrl.u32 %v1399_v45, %v100_v31 }
  0xc9   :  { %v109_v48 = vshrl.u32 %v1394_v32, %v100_v31  ;;  %v101_v52 = vshrl.u32 %v1397_v40, %v100_v31  ;;  %vm118_vm3 = vcmp.lt.s32.totalorder %v98_v30, 2  ;;  %vm119_vm4 = vcmp.lt.s32.totalorder %v98_v30, 3 }
  0xca   :  { %v113_v49 = vor.u32 %v112_v37, %v111_v33  ;;  %v116_v50 = vor.u32 %v115_v39, %v114_v35  ;;  %v104_v51 = vor.u32 %v103_v43, %v102_v41  ;;  %v107_v53 = vor.u32 %v106_v46, %v105_v44 }
  0xcb   :  { %v110_v54 = vor.u32 %v109_v48, %v108_v47 }
  0xcc   :  { %v126_v55 = vsel %vm120_vm1, %v113_v49, 920167782  ;;  %v130_v56 = vsel %vm120_vm1, %v116_v50, 1326507024  ;;  %v125_v58 = vsel %vm117_vm2, %v104_v51, %v107_v53  ;;  %v121_v61 = vsel %vm117_vm2, %v101_v52, %v104_v51 }
  0xcd   :  { %v122_v57 = vsel %vm120_vm1, %v110_v54, 2102212464  ;;  %v127_v59 = vsel %vm119_vm4, %v110_v54, %v126_v55  ;;  %v129_v60 = vsel %vm117_vm2, %v107_v53, %v110_v54  ;;  %v131_v1 = vsel %vm119_vm4, %v113_v49, %v130_v56 }
  0xce   :  { %v123_v62 = vsel %vm119_vm4, %v107_v53, %v122_v57  ;;  %v128_v63 = vsel %vm118_vm3, %v125_v58, %v127_v59  ;;  %v132_v2 = vsel %vm118_vm3, %v129_v60, %v131_v1  ;;  %v1224_v57 = vld [vmem:[#allocation4] sm:$0xff]   ;;  %v1400_v58 = vmov 0.0   ;;  %v1225_v59 = vld [vmem:[#allocation4 + $0x8] sm:$0xff]   ;;  %v1226_v60 = vld [vmem:[#allocation4 + $0x10] sm:$0xff]  }
  0xcf   :  { %v1503_v3 = vmul.u32.u64.low %v133_v36, %v128_v63  ;;  %v1504_v4 = vmul.u32.u64.high %v133_v36, %v128_v63, %v1503_v3  ;;  %v1506_v5 = vmul.u32.u64.low %v133_v36, %v132_v2  ;;  %v1507_v6 = vmul.u32.u64.high %v133_v36, %v132_v2, %v1506_v5  ;;  %1167 = vmatprep.subr.bf16.mxu1 %v1400_v58  ;;  %1183 = vmatprep.mubr.msk.bf16.mxu1 %vm1401_vm0, %v1400_v58  ;;  %v1230_v63 = vld [vmem:[#allocation4 + $0x30] sm:$0xff]   ;;  %v1231_v1 = vld [vmem:[#allocation4 + $0x38] sm:$0xff]  }
  0xd0   :  { %v124_v7 = vsel %vm118_vm3, %v121_v61, %v123_v62  ;;  %1168 = vmatpush3.bf16.msra.mxu1 %v1224_v57  ;;  %v1228_v61 = vld [vmem:[#allocation4 + $0x20] sm:$0xff]   ;;  %v1229_v62 = vld [vmem:[#allocation4 + $0x28] sm:$0xff]  }
  0xd1   :  { %v143_v8 = vadd.s32 1, %v1504_v4  ;;  %v140_v9 = vmul.u32 %v133_v36, %v124_v7  ;;  %vm142_vm5 = vc.u32 %v1507_v6, %v1503_v3  ;;  %v141_v23 = vadd.s32 %v1503_v3, %v1507_v6  ;;  %1169 = vmatprep.subr.bf16.mxu1 %v1400_v58  ;;  %v1060_v3 = vld [vmem:[%s1551_s3] ss:$0 sm:$0xff] }
  0xd3   :  { %v144_v10 = vsel %vm142_vm5, %v143_v8, %v1504_v4 }
  0xd4   :  { %v145_v11 = vadd.s32 %v144_v10, %v140_v9  ;;  %1170 = vmatpush3.bf16.msra.mxu1 %v1225_v59 }
  0xd5   :  { %1171 = vmatprep.subr.bf16.mxu1 %v1400_v58 }
  0xd6   :  { %v146_v12 = vadd.s32 536870912, %v145_v11 }
  0xd8   :  { %v147_v13 = vshrl.u32 %v146_v12, 30  ;;  %1172 = vmatpush3.bf16.msra.mxu1 %v1226_v60  ;;  %v1280_v60 = vld [vmem:[#allocation6 + $0x10] ss:$24 sps:$4 sm:$0xff]  }
  0xd9   :  { %1173 = vmatprep.subr.bf16.mxu1 %v1400_v58 }
  0xda   :  { %v148_v14 = vshll.u32 %v147_v13, 30  ;;  %v171_v35 = vsub.s32 4, %v147_v13 }
  0xdc   :  { %v149_v15 = vsub.s32 %v145_v11, %v148_v14  ;;  %v172_v38 = vsel %vm87_vm7, %v171_v35, %v147_v13  ;;  %v1261_v35 = vld [vmem:[#allocation6 + $0xcc] ss:$24 sps:$4 sm:$0xff]  }
  0xdd   :  { %v174_v40 = vsel %vm86_vm8, 0, %v172_v38  ;;  %v1262_v38 = vld [vmem:[#allocation6 + $0xf0] ss:$24 sps:$4 sm:$0xff]  }
  0xde   :  { %v151_v16 = vsub.s32 0, %v149_v15  ;;  %v281_v41 = vadd.s32 3, %v174_v40  ;;  %v178_v42 = vand.u32 3, %v174_v40  ;;  %v1265_v40 = vld [vmem:[#allocation6 + $0xf8] ss:$24 sps:$4 sm:$0xff]  }
  0xe0   :  { %v1053_v17 = vmin.u32 %v151_v16, %v149_v15  ;;  %v282_v43 = vand.u32 3, %v281_v41  ;;  %vm183_vm9 = vcmp.eq.s32.totalorder %v178_v42, 2  ;;  %vm180_vm11 = vcmp.eq.s32.totalorder %v178_v42, 0  ;;  %v1232_v16 = vld [vmem:[#allocation6] ss:$24 sps:$4 sm:$0xff]  }
  0xe1   :  { %vm179_vm13 = vcmp.lt.s32.totalorder %v178_v42, 2  ;;  %v1270_v41 = vld [vmem:[#allocation6 + $0x124] ss:$24 sps:$4 sm:$0xff]   ;;  %v1268_v42 = vld [vmem:[#allocation6 + $0x120] ss:$24 sps:$4 sm:$0xff]  }
  0xe2   :  { %v153_v18 = vclz %v1053_v17  ;;  %vm287_vm10 = vcmp.eq.s32.totalorder %v282_v43, 2  ;;  %vm284_vm12 = vcmp.eq.s32.totalorder %v282_v43, 0  ;;  %vm283_vm14 = vcmp.lt.s32.totalorder %v282_v43, 2  ;;  %v1237_v17 = vld [vmem:[#allocation6 + $0xc] ss:$24 sps:$4 sm:$0xff]  }
  0xe3   :  { %v1273_v43 = vld [vmem:[#allocation6 + $0x12c] ss:$24 sps:$4 sm:$0xff]  }
  0xe4   :  { %v1054_v19 = vadd.s32 4294967294, %v153_v18  ;;  %v1235_v18 = vld [vmem:[#allocation6 + $0x8] ss:$24 sps:$4 sm:$0xff]  }
  0xe6   :  { %vm1055_vm6 = vcmp.lt.s32.totalorder %v1054_v19, 0 }
  0xe7   :  { %v156_v21 = vsel %vm1055_vm6, 0, %v1054_v19  ;;  %v1240_v19 = vld [vmem:[#allocation6 + $0x34] ss:$24 sps:$4 sm:$0xff]  }
  0xe8   :  { %v157_v24 = vsub.s32 32, %v156_v21  ;;  %v161_v25 = vsub.s32 4294967266, %v156_v21  ;;  %v158_v26 = vshll.u32 %v149_v15, %v156_v21  ;;  %v1234_v15 = vld [vmem:[#allocation6 + $0x4] ss:$24 sps:$4 sm:$0xff]   ;;  %v1238_v21 = vld [vmem:[#allocation6 + $0x30] ss:$24 sps:$4 sm:$0xff]  }
  0xe9   :  { %916 = vmatprep.subr.bf16.mxu0 %v1234_v15  ;;  %v644_v15 = vld [vmem:[%s1555_s7] sm:$0x3f] }
  0xea   :  { %v159_v27 = vshrl.u32 %v141_v23, %v157_v24  ;;  %v162_v28 = vadd.s32 127, %v161_v25  ;;  %v1243_v23 = vld [vmem:[#allocation6 + $0x3c] ss:$24 sps:$4 sm:$0xff]   ;;  %v1241_v24 = vld [vmem:[#allocation6 + $0x38] ss:$24 sps:$4 sm:$0xff]  }
  0xeb   :  { %v1246_v25 = vld [vmem:[#allocation6 + $0x64] ss:$24 sps:$4 sm:$0xff]  }
  0xec   :  { %v160_v29 = vor.u32 %v159_v27, %v158_v26  ;;  %v163_v30 = vshll.u32 %v162_v28, 23  ;;  %v1244_v26 = vld [vmem:[#allocation6 + $0x60] ss:$24 sps:$4 sm:$0xff]   ;;  %v1249_v27 = vld [vmem:[#allocation6 + $0x6c] ss:$24 sps:$4 sm:$0xff]  }
  0xed   :  { %v1247_v28 = vld [vmem:[#allocation6 + $0x68] ss:$24 sps:$4 sm:$0xff]  }
  0xee   :  { %v164_v31 = vor.u32 4788187, %v163_v30  ;;  %v167_v33 = vcvt.s32.f32 %v160_v29  ;;  %v1252_v29 = vld [vmem:[#allocation6 + $0x94] ss:$24 sps:$4 sm:$0xff]   ;;  %v1250_v30 = vld [vmem:[#allocation6 + $0x90] ss:$24 sps:$4 sm:$0xff]  }
  0xf0   :  { %v165_v32 = vand.u32 2147483647, %v164_v31  ;;  %v1255_v31 = vld [vmem:[#allocation6 + $0x9c] ss:$24 sps:$4 sm:$0xff]  }
  0xf2   :  { %v168_v34 = vmul.f32 %v167_v33, %v165_v32  ;;  %v1253_v32 = vld [vmem:[#allocation6 + $0x98] ss:$24 sps:$4 sm:$0xff]   ;;  %v1258_v33 = vld [vmem:[#allocation6 + $0xc4] ss:$24 sps:$4 sm:$0xff]  }
  0xf4   :  { %v169_v36 = vxor.u32 2147483648, %v168_v34 }
  0xf6   :  { %v170_v37 = vsel %vm87_vm7, %v169_v36, %v168_v34  ;;  %v1256_v34 = vld [vmem:[#allocation6 + $0xc0] ss:$24 sps:$4 sm:$0xff]  }
  0xf7   :  { %v173_v39 = vsel %vm86_vm8, %v1497_v20, %v170_v37  ;;  %v1227_v20 = vld [vmem:[#allocation4 + $0x18] sm:$0xff]   ;;  %v1259_v36 = vld [vmem:[#allocation6 + $0xc8] ss:$24 sps:$4 sm:$0xff]   ;;  %v1264_v37 = vld [vmem:[#allocation6 + $0xf4] ss:$24 sps:$4 sm:$0xff]  }
  0xf8   :  { %1304 = vcosq.f32 %v173_v39  ;;  %1174 = vmatpush3.bf16.msra.mxu1 %v1227_v20 }
  0xf9   :  { %1306 = vsinq.f32 %v173_v39  ;;  %1175 = vmatprep.subr.bf16.mxu1 %v1400_v58  ;;  %v1267_v39 = vld [vmem:[#allocation6 + $0xfc] ss:$24 sps:$4 sm:$0xff]  }
  0xfc   :  { %1176 = vmatpush3.bf16.msra.mxu1 %v1228_v61  ;;  %v1285_v61 = vld [vmem:[#allocation6 + $0x44] ss:$24 sps:$4 sm:$0xff]  }
  0xfd   :  { %1177 = vmatprep.subr.bf16.mxu1 %v1400_v58 }
 0x100   :  { %1178 = vmatpush3.bf16.msra.mxu1 %v1229_v62  ;;  %v1283_v62 = vld [vmem:[#allocation6 + $0x40] ss:$24 sps:$4 sm:$0xff]  }
 0x101   :  { %1179 = vmatprep.subr.bf16.mxu1 %v1400_v58 }
 0x102   :  { %v1305_v44 = vpop.eup %1304 }
 0x103   :  { %v1307_v45 = vpop.eup %1306  ;;  %v184_v46 = vxor.u32 2147483648, %v1305_v44 }
 0x104   :  { %v181_v47 = vxor.u32 2147483648, %v1307_v45  ;;  %1180 = vmatpush3.bf16.msra.mxu1 %v1230_v63  ;;  %v1288_v63 = vld [vmem:[#allocation6 + $0x74] ss:$24 sps:$4 sm:$0xff]  }
 0x105   :  { %v185_v48 = vsel %vm183_vm9, %v184_v46, %v1307_v45  ;;  %v289_v22 = vsel %vm287_vm10, %v184_v46, %v1307_v45  ;;  %1181 = vmatprep.subr.bf16.mxu1 %v1400_v58  ;;  %v1276_v45 = vld [vmem:[#allocation6 + $0x154] ss:$24 sps:$4 sm:$0xff]   ;;  %v1274_v46 = vld [vmem:[#allocation6 + $0x150] ss:$24 sps:$4 sm:$0xff]  }
 0x106   :  { %v182_v49 = vsel %vm180_vm11, %v1305_v44, %v181_v47  ;;  %v286_v50 = vsel %vm284_vm12, %v1305_v44, %v181_v47  ;;  %v1271_v44 = vld [vmem:[#allocation6 + $0x128] ss:$24 sps:$4 sm:$0xff]   ;;  %v1279_v47 = vld [vmem:[#allocation6 + $0x15c] ss:$24 sps:$4 sm:$0xff]  }
 0x107   :  { %v186_v51 = vsel %vm179_vm13, %v182_v49, %v185_v48  ;;  %v290_v52 = vsel %vm283_vm14, %v286_v50, %v289_v22  ;;  %v1277_v48 = vld [vmem:[#allocation6 + $0x158] ss:$24 sps:$4 sm:$0xff]   ;;  %v1282_v22 = vld [vmem:[#allocation6 + $0x14] ss:$24 sps:$4 sm:$0xff]   ;;  %v1078_v49 = vld [vmem:[%s1553_s5] ss:$0 sm:$0xff] }
 0x108   :  { %v187_v53 = vsel %vm177_vm15, nan, %v186_v51  ;;  %v291_v54 = vsel %vm177_vm15, nan, %v290_v52  ;;  %1182 = vmatpush3.bf16.msra.mxu1 %v1231_v1  ;;  %v1286_v1 = vld [vmem:[#allocation6 + $0x70] ss:$24 sps:$4 sm:$0xff]  }
 0x109   :  { %v292_v55 = vpack.c.bf16 %v187_v53, %v187_v53  ;;  %v293_v56 = vpack.c.bf16 %v291_v54, %v291_v54  ;;  %957 = vmatprep.subr.bf16.mxu1 %v1237_v17 }
 0x10b   :  { %461 = vmatprep.mubr.bf16.mxu0 %v293_v56 }
 0x10c   :  { %462 = vmatmul.mubr.bf16.vlgmr.msra.gmra.mrb[0].mxu0 %v292_v55 }
 0x10d   :  { %948 = vmatprep.mubr.bf16.mxu0 %v1393_v0  ;;  %917 = vmatpush1.bf16.msra.mxu0 %v1232_v16 }
 0x10e   :  { %918 = vmatprep.subr.bf16.mxu0 %v1240_v19 }
 0x111   :  { %919 = vmatpush1.bf16.msra.mxu0 %v1238_v21 }
 0x112   :  { %920 = vmatprep.subr.bf16.mxu0 %v1246_v25 }
 0x115   :  { %921 = vmatpush1.bf16.msra.mxu0 %v1244_v26 }
 0x116   :  { %922 = vmatprep.subr.bf16.mxu0 %v1252_v29 }
 0x119   :  { %923 = vmatpush1.bf16.msra.mxu0 %v1250_v30 }
 0x11a   :  { %924 = vmatprep.subr.bf16.mxu0 %v1258_v33 }
 0x11d   :  { %925 = vmatpush1.bf16.msra.mxu0 %v1256_v34 }
 0x11e   :  { %926 = vmatprep.subr.bf16.mxu0 %v1264_v37 }
 0x121   :  { %927 = vmatpush1.bf16.msra.mxu0 %v1262_v38 }
 0x122   :  { %928 = vmatprep.subr.bf16.mxu0 %v1270_v41 }
 0x125   :  { %929 = vmatpush1.bf16.msra.mxu0 %v1268_v42 }
 0x126   :  { %930 = vmatprep.subr.bf16.mxu0 %v1276_v45 }
 0x129   :  { %931 = vmatpush1.bf16.msra.mxu0 %v1274_v46 }
 0x12a   :  { %998 = vmatprep.subr.bf16.mxu0 %v1282_v22 }
 0x1df   :  { %v1152_v2 = vpop.f32.mrb[0].mxu0 }
 0x1e0   :  { %v1153_v4 = vpop.f32.mrb[1].mxu0 }
 0x1e1   :  { %v1154_v5 = vadd.f32 %v1153_v4, %v1152_v2  ;;  %v1155_v6 = vpop.f32.mrb[2].mxu0  ;;  %v1291_v2 = vld [vmem:[#allocation6 + $0xa4] ss:$24 sps:$4 sm:$0xff]   ;;  %v1294_v4 = vld [vmem:[#allocation6 + $0xd4] ss:$24 sps:$4 sm:$0xff]  }
 0x1e2   :  { %v1156_v7 = vpop.f32.mrb[3].mxu0  ;;  %v1297_v6 = vld [vmem:[#allocation6 + $0x104] ss:$24 sps:$4 sm:$0xff]  }
 0x1e3   :  { %v464_v8 = vadd.f32 %v1154_v5, %v1060_v3  ;;  %v1289_v3 = vld [vmem:[#allocation6 + $0xa0] ss:$24 sps:$4 sm:$0xff]   ;;  %v1292_v5 = vld [vmem:[#allocation6 + $0xd0] ss:$24 sps:$4 sm:$0xff]  }
 0x1e4   :  { %v1295_v7 = vld [vmem:[#allocation6 + $0x100] ss:$24 sps:$4 sm:$0xff]  }
 0x1e5   :  { %v1077_v9 = vmul.f32 -1.442695, %v464_v8 }
 0x1e7   :  { %1308 = vpow2.f32 %v1077_v9  ;;  %v1303_v9 = vld [vmem:[#allocation6 + $0x164] ss:$24 sps:$4 sm:$0xff]  }
 0x1f1   :  { %v1309_v10 = vpop.eup %1308 }
 0x1f2   :  { %v472_v11 = vadd.f32 1.0, %v1309_v10  ;;  %v1301_v10 = vld [vmem:[#allocation6 + $0x160] ss:$24 sps:$4 sm:$0xff]  }
 0x1f4   :  { %1310 = vrcp.f32 %v472_v11  ;;  %v646_v11 = vlaneseq }
 0x1fe   :  { %v1311_v12 = vpop.eup %1310 }
 0x1ff   :  { %v475_v13 = vmul.f32 %v1311_v12, %v464_v8  ;;  %v1300_v8 = vld [vmem:[#allocation6 + $0x134] ss:$24 sps:$4 sm:$0xff]   ;;  %v647_v12 = vshrl.u32 %v646_v11, 7 }
 0x201   :  { %v476_v14 = vpack.c.bf16 %v475_v13, %v475_v13  ;;  %v648_v13 = vsub.s32 0, %v647_v12  ;;  %v652_v16 = vsub.s32 1, %v647_v12  ;;  %v660_v17 = vsub.s32 3, %v647_v12 }
 0x202   :  { %v668_v37 = vsub.s32 5, %v647_v12 }
 0x203   :  { %1184 = vmatmul.mubr.bf16.vlgmr.msra.gmra.mrb[0].mxu1 %v476_v14  ;;  %v656_v14 = vsub.s32 2, %v647_v12  ;;  %v653_v21 = vrot.slane %v644_v15, %v652_v16 }
 0x204   :  { %989 = vmatprep.mubr.bf16.mxu1 %v1393_v0  ;;  %958 = vmatpush1.bf16.msra.mxu1 %v1235_v18  ;;  %v649_v18 = vrot.slane %v644_v15, %v648_v13 }
 0x205   :  { %959 = vmatprep.subr.bf16.mxu1 %v1243_v23  ;;  %v657_v19 = vrot.slane %v644_v15, %v656_v14  ;;  %v661_v23 = vrot.slane %v644_v15, %v660_v17 }
 0x208   :  { %960 = vmatpush1.bf16.msra.mxu1 %v1241_v24 }
 0x209   :  { %961 = vmatprep.subr.bf16.mxu1 %v1249_v27 }
 0x20c   :  { %962 = vmatpush1.bf16.msra.mxu1 %v1247_v28 }
 0x20d   :  { %963 = vmatprep.subr.bf16.mxu1 %v1255_v31 }
 0x210   :  { %964 = vmatpush1.bf16.msra.mxu1 %v1253_v32 }
 0x211   :  { %965 = vmatprep.subr.bf16.mxu1 %v1261_v35 }
 0x214   :  { %966 = vmatpush1.bf16.msra.mxu1 %v1259_v36  ;;  %v664_v36 = vsub.s32 4, %v647_v12 }
 0x215   :  { %967 = vmatprep.subr.bf16.mxu1 %v1267_v39  ;;  %v669_v39 = vrot.slane %v644_v15, %v668_v37 }
 0x216   :  { %v665_v38 = vrot.slane %v644_v15, %v664_v36 }
 0x218   :  { %968 = vmatpush1.bf16.msra.mxu1 %v1265_v40 }
 0x219   :  { %969 = vmatprep.subr.bf16.mxu1 %v1273_v43 }
 0x21c   :  { %970 = vmatpush1.bf16.msra.mxu1 %v1271_v44 }
 0x21d   :  { %971 = vmatprep.subr.bf16.mxu1 %v1279_v47 }
 0x220   :  { %972 = vmatpush1.bf16.msra.mxu1 %v1277_v48 }
 0x2d6   :  { %v582_v50 = vpop.f32.mrb[0].mxu1 }
 0x2d7   :  { %v583_v51 = vadd.f32 %v1078_v49, %v582_v50  ;;  %v1185_v52 = vpop.f32.mrb[1].mxu1 }
 0x2d8   :  { %v585_v53 = vpop.f32.mrb[2].mxu1 }
 0x2d9   :  { %v1087_v54 = vmul.f32 -1.442695, %v583_v51  ;;  %v1186_v55 = vpop.f32.mrb[3].mxu1 }
 0x2db   :  { %1312 = vpow2.f32 %v1087_v54 }
 0x2e5   :  { %v1313_v56 = vpop.eup %1312 }
 0x2e6   :  { %v591_v57 = vadd.f32 1.0, %v1313_v56 }
 0x2e8   :  { %1314 = vrcp.f32 %v591_v57 }
 0x2f2   :  { %v1315_v58 = vpop.eup %1314 }
 0x2f3   :  { %v594_v59 = vmul.f32 %v1315_v58, %v583_v51 }
 0x2f5   :  { %v595_v20 = vpack.c.bf16 %v594_v59, %v594_v59 }
 0x2f7   :  { %949 = vmatmul.mubr.bf16.vlgmr.msra.gmra.mrb[4].mxu0 %v595_v20  ;;  %990 = vmatmul.mubr.bf16.vlgmr.msra.gmra.mrb[4].mxu1 %v595_v20 }
 0x2f8   :  { %999 = vmatpush1.bf16.msra.mxu0 %v1280_v60  ;;  %1030 = vmatprep.mubr.bf16.mxu0 %v1393_v0  ;;  %v1298_v0 = vld [vmem:[#allocation6 + $0x130] ss:$24 sps:$4 sm:$0xff]  }
 0x2f9   :  { %1000 = vmatprep.subr.bf16.mxu0 %v1285_v61 }
 0x2fc   :  { %1001 = vmatpush1.bf16.msra.mxu0 %v1283_v62 }
 0x2fd   :  { %1002 = vmatprep.subr.bf16.mxu0 %v1288_v63 }
 0x300   :  { %1003 = vmatpush1.bf16.msra.mxu0 %v1286_v1 }
 0x301   :  { %1004 = vmatprep.subr.bf16.mxu0 %v1291_v2 }
 0x304   :  { %1005 = vmatpush1.bf16.msra.mxu0 %v1289_v3 }
 0x305   :  { %1006 = vmatprep.subr.bf16.mxu0 %v1294_v4 }
 0x308   :  { %1007 = vmatpush1.bf16.msra.mxu0 %v1292_v5 }
 0x309   :  { %1008 = vmatprep.subr.bf16.mxu0 %v1297_v6 }
 0x30c   :  { %1009 = vmatpush1.bf16.msra.mxu0 %v1295_v7 }
 0x30d   :  { %1010 = vmatprep.subr.bf16.mxu0 %v1300_v8 }
 0x310   :  { %1011 = vmatpush1.bf16.msra.mxu0 %v1298_v0 }
 0x311   :  { %1012 = vmatprep.subr.bf16.mxu0 %v1303_v9 }
 0x314   :  { %1013 = vmatpush1.bf16.msra.mxu0 %v1301_v10 }
 0x317   :  { %1031 = vmatmul.mubr.bf16.vlgmr.msra.gmra.mrb[8].mxu0 %v595_v20 }
 0x3ca   :  { %v950_v24 = vpop.f32.mrb[4].mxu0  ;;  %v991_v25 = vpop.f32.mrb[4].mxu1 }
 0x3cb   :  { %v951_v26 = vadd.f32 %v950_v24, %v649_v18  ;;  %v992_v27 = vadd.f32 %v991_v25, %v657_v19  ;;  %v952_v28 = vpop.f32.mrb[5].mxu0  ;;  %v993_v29 = vpop.f32.mrb[5].mxu1 }
 0x3cc   :  { %v953_v30 = vadd.f32 %v952_v28, %v653_v21  ;;  %v994_v31 = vadd.f32 %v993_v29, %v661_v23  ;;  %v954_v32 = vpop.f32.mrb[6].mxu0  ;;  %v995_v33 = vpop.f32.mrb[6].mxu1 }
 0x3cd   :  { %1039 = vst [vmem:[%s1556_s8] sm:$0xff] %v951_v26  ;;  %1041 = vst [vmem:[%s1556_s8 + $0x10] sm:$0xff] %v992_v27  ;;  %v955_v34 = vpop.f32.mrb[7].mxu0  ;;  %v996_v35 = vpop.f32.mrb[7].mxu1 }
 0x3ce   :  { %1040 = vst [vmem:[%s1556_s8 + $0x8] sm:$0xff] %v953_v30  ;;  %1042 = vst [vmem:[%s1556_s8 + $0x18] sm:$0xff] %v994_v31 }
 0x3ea   :  { %v1032_v40 = vpop.f32.mrb[8].mxu0 }
 0x3eb   :  { %v1033_v41 = vadd.f32 %v1032_v40, %v665_v38  ;;  %v1034_v42 = vpop.f32.mrb[9].mxu0 }
 0x3ec   :  { %v1035_v43 = vadd.f32 %v1034_v42, %v669_v39  ;;  %v1036_v44 = vpop.f32.mrb[10].mxu0 }
 0x3ed   :  { %1043 = vst [vmem:[%s1556_s8 + $0x20] sm:$0xff] %v1033_v41  ;;  %v1037_v45 = vpop.f32.mrb[11].mxu0 }
 0x3ee   :  { %1044 = vst [vmem:[%s1556_s8 + $0x28] sm:$0xff] %v1035_v43 }
 0x3ef   :  { %1049 = vsyncpa [#allocation3], 1 }
 0x3f0   :  { %1050 = vsyncpa [#allocation5], 1 }

</bundles_post_ra>
